<compile_context>
chip_gen: v6e
topology: v6e:2x2x1
jax: 0.10.0
libtpu: 0.0.40
codegen_flags: <defaults>
</compile_context>

<pallas_src>
import math
from functools import partial

import jax
import jax.numpy as jnp
from jax.experimental import pallas as pl
from jax.experimental.pallas import tpu as pltpu


def _round_up(x: int, m: int) -> int:
    return ((x + m - 1) // m) * m


# ---------------------------------------------------------------------------
# Kernels
# ---------------------------------------------------------------------------
def _conv_act_kernel_const(w_ref, p_ref, o_ref, *, slope):
    # w_ref: (Cp, Kp) bf16 weights (bias folded into column K); p_ref: (Kp, TM) bf16 patches.
    acc = jnp.dot(w_ref[...], p_ref[...], preferred_element_type=jnp.float32)
    o_ref[...] = jnp.where(acc >= 0.0, acc, slope * acc).astype(o_ref.dtype)


def _conv_act_kernel_smem(w_ref, p_ref, s_ref, o_ref):
    acc = jnp.dot(w_ref[...], p_ref[...], preferred_element_type=jnp.float32)
    slope = s_ref[0]
    o_ref[...] = jnp.where(acc >= 0.0, acc, slope * acc).astype(o_ref.dtype)


def _pool_act_kernel_const(xw_ref, o_ref, *, slope):
    # xw_ref: (pool*pool, 8, Mcols) -- dense full-vreg tiles; reduce the window axis.
    m = jnp.max(xw_ref[...], axis=0)                  # (8, Mcols)
    o_ref[...] = jnp.where(m >= 0.0, m, slope * m).astype(o_ref.dtype)


def _pool_act_kernel_smem(xw_ref, s_ref, o_ref):
    m = jnp.max(xw_ref[...], axis=0)
    slope = s_ref[0]
    o_ref[...] = jnp.where(m >= 0.0, m, slope * m).astype(o_ref.dtype)


# ---------------------------------------------------------------------------
# Wrappers (jit-ed so the layout plumbing fuses with pre/post processing)
# ---------------------------------------------------------------------------
@partial(jax.jit, static_argnames=("const_slope",))
def conv2d_act_pallas(x, w, b, slope=None, *, const_slope=None):
    """Conv2d(stride=1, padding=0) fused with leaky/PReLU activation (transposed im2col matmul)."""
    N, Cin, H, W = x.shape
    Cout, _, KH, KW = w.shape
    Ho, Wo = H - KH + 1, W - KW + 1
    M, K = N * Ho * Wo, Cin * KH * KW

    # im2col, transposed: patches (K, M) so the big M dim lands on lanes.
    rows = [x[:, :, i:i + Ho, j:j + Wo] for i in range(KH) for j in range(KW)]
    pat = jnp.stack(rows, axis=0).reshape(KH, KW, N, Cin, Ho, Wo)
    pat = pat.transpose(3, 0, 1, 2, 4, 5).reshape(K, M)        # k = c*KH*KW + i*KW + j

    # Fold bias into the matmul: ones row in patches, bias column in the weight matrix.
    pat = jnp.concatenate([pat, jnp.ones((1, M), pat.dtype)], axis=0)           # (K+1, M)
    wmat = jnp.concatenate([w.reshape(Cout, K), b.reshape(Cout, 1)], axis=1)    # (Cout, K+1)

    Kp = _round_up(K + 1, 128)
    Cp = _round_up(Cout, 8)
    Mp = _round_up(M, 128)
    # Two blocks so both v7x TensorCores get work; one block if M is too small to split.
    tm = Mp // 2 if (Mp % 256 == 0 and Mp >= 256) else Mp

    # bf16 MXU operands (native on v6e/v7x); accumulation/activation stay f32.
    pat = jnp.pad(pat, ((0, Kp - (K + 1)), (0, Mp - M))).astype(jnp.bfloat16)
    wmat = jnp.pad(wmat, ((0, Cp - Cout), (0, Kp - (K + 1)))).astype(jnp.bfloat16)

    if const_slope is not None:
        kernel = partial(_conv_act_kernel_const, slope=float(const_slope))
        extra_in, extra_specs = (), ()
    else:
        kernel = _conv_act_kernel_smem
        extra_in = (slope,)
        extra_specs = (pl.BlockSpec(memory_space=pltpu.MemorySpace.SMEM),)

    out = pl.pallas_call(
        kernel,
        out_shape=jax.ShapeDtypeStruct((Cp, Mp), jnp.float32),
        grid=(Mp // tm,),
        in_specs=[
            pl.BlockSpec((Cp, Kp), lambda i: (0, 0)),
            pl.BlockSpec((Kp, tm), lambda i: (0, i)),
            *extra_specs,
        ],
        out_specs=pl.BlockSpec((Cp, tm), lambda i: (0, i)),
        compiler_params=pltpu.CompilerParams(dimension_semantics=("parallel",)),
    )(wmat, pat, *extra_in)

    # (Cout, M) -> (N, Cout, Ho, Wo)
    return out[:Cout, :M].reshape(Cout, N, Ho, Wo).transpose(1, 0, 2, 3)


@partial(jax.jit, static_argnames=("pool", "const_slope"))
def maxpool2d_act_pallas(x, slope=None, *, pool=3, const_slope=None):
    """MaxPool2d(pool) (stride=pool, no padding) fused with leaky/PReLU activation."""
    N, C, H, W = x.shape
    Ho, Wo = (H - pool) // pool + 1, (W - pool) // pool + 1
    M = N * C * Ho * Wo

    # Window extraction: (pool*pool, M) -- window elems leading, pooled outputs lane-dense.
    xc = x[:, :, :Ho * pool, :Wo * pool].reshape(N, C, Ho, pool, Wo, pool)
    win = xc.transpose(3, 5, 0, 1, 2, 4).reshape(pool * pool, M)

    Mp = _round_up(M, 8 * 128)
    Mcols = Mp // 8
    # Zero-pad: padded columns are all-zero windows -> max=0, act(0)=0, no +/-inf anywhere.
    win = jnp.pad(win, ((0, 0), (0, Mp - M))).reshape(pool * pool, 8, Mcols)

    if const_slope is not None:
        kernel = partial(_pool_act_kernel_const, slope=float(const_slope))
        extra_in, extra_specs = (), ()
    else:
        kernel = _pool_act_kernel_smem
        extra_in = (slope,)
        extra_specs = (pl.BlockSpec(memory_space=pltpu.MemorySpace.SMEM),)

    out = pl.pallas_call(
        kernel,
        out_shape=jax.ShapeDtypeStruct((8, Mcols), jnp.float32),
        grid=(1,),
        in_specs=[
            pl.BlockSpec((pool * pool, 8, Mcols), lambda i: (0, 0, 0)),
            *extra_specs,
        ],
        out_specs=pl.BlockSpec((8, Mcols), lambda i: (0, 0)),
        compiler_params=pltpu.CompilerParams(dimension_semantics=("parallel",)),
    )(win, *extra_in)

    return out.reshape(Mp)[:M].reshape(N, C, Ho, Wo)


class ModuleDictModelPallas:
    """Pallas port of ModuleDictModel: choices={'conv','pool'}, activations={'lrelu','prelu'}."""

    def __init__(self, key):
        kw, kb = jax.random.split(key)
        cin, cout, ksz = 10, 10, 3
        bound = 1.0 / math.sqrt(cin * ksz * ksz)
        self.conv_w = jax.random.uniform(kw, (cout, cin, ksz, ksz), jnp.float32, -bound, bound)
        self.conv_b = jax.random.uniform(kb, (cout,), jnp.float32, -bound, bound)
        # PyTorch defaults: LeakyReLU(negative_slope=0.01) -> compile-time constant;
        # PReLU(num_parameters=1, init=0.25) -> learnable runtime scalar (SMEM operand).
        self.lrelu_slope = 0.01
        self.prelu_w = jnp.array([0.25], dtype=jnp.float32)

    def __call__(self, x, layer_type: str, activation_type: str):
        # ModuleDict indexing == Python-level dispatch (same as PyTorch trace-time behavior).
        if activation_type == "lrelu":
            slope_arr, const = None, self.lrelu_slope
        elif activation_type == "prelu":
            slope_arr, const = self.prelu_w, None
        else:
            raise KeyError(activation_type)

        if layer_type == "conv":
            return conv2d_act_pallas(x, self.conv_w, self.conv_b, slope_arr, const_slope=const)
        elif layer_type == "pool":
            return maxpool2d_act_pallas(x, slope_arr, pool=3, const_slope=const)
        else:
            raise KeyError(layer_type)


# ---------------------------------------------------------------------------
# Pure-JAX reference for validation
# ---------------------------------------------------------------------------
def _ref_forward(x, w, b, layer_type, slope):
    if layer_type == "conv":
        N, Cin, H, W = x.shape
        Cout, _, KH, KW = w.shape
        Ho, Wo = H - KH + 1, W - KW + 1
        out = jnp.zeros((N, Cout, Ho, Wo), jnp.float32)
        for i in range(KH):
            for j in range(KW):
                out = out + jnp.einsum("nchw,oc->nohw",
                                       x[:, :, i:i + Ho, j:j + Wo], w[:, :, i, j])
        out = out + b[None, :, None, None]
    else:
        N, C, H, W = x.shape
        Ho, Wo = (H - 3) // 3 + 1, (W - 3) // 3 + 1
        out = x[:, :, :Ho * 3, :Wo * 3].reshape(N, C, Ho, 3, Wo, 3).max(axis=(3, 5))
    return jnp.where(out >= 0, out, slope * out)


if __name__ == "__main__":
    key = jax.random.PRNGKey(0)
    kx, kparams = jax.random.split(key)
    # Conv2d(10, 10, 3) requires 10 input channels; small spatial map.
    x = jax.random.normal(kx, (2, 10, 16, 16), dtype=jnp.float32)

    model = ModuleDictModelPallas(kparams)

    expected_shapes = {"conv": (2, 10, 14, 14), "pool": (2, 10, 5, 5)}
    for layer_type in ("conv", "pool"):
        for act_type in ("lrelu", "prelu"):
            y = model(x, layer_type, act_type)
            jax.block_until_ready(y)
            assert y.shape == expected_shapes[layer_type], (layer_type, y.shape)
            assert y.dtype == jnp.float32

            slope = 0.01 if act_type == "lrelu" else float(model.prelu_w[0])
            ref = _ref_forward(x, model.conv_w, model.conv_b, layer_type, slope)
            assert bool(jnp.all(jnp.isfinite(y))), (layer_type, act_type, "non-finite output")
            assert bool(jnp.allclose(y, ref, atol=1e-2, rtol=1e-2)), (
                layer_type, act_type, float(jnp.max(jnp.abs(y - ref))))

    print("KERNEL_OK")
</pallas_src>

<mosaic_0001>
module attributes {stable_mosaic.version = 11 : i64} {
  func.func @_conv_act_kernel_const(%arg0: i32, %arg1: memref<16x128xbf16, #tpu.memory_space<vmem>>, %arg2: memref<128x256xbf16, #tpu.memory_space<vmem>>, %arg3: memref<16x256xf32, #tpu.memory_space<vmem>>) attributes {dimension_semantics = [#tpu.dimension_semantics<parallel>], iteration_bounds = array<i64: 2>, scalar_prefetch = 0 : i64, scratch_operands = 0 : i64, tpu.core_type = #tpu.core_type<tc>, window_params = [{pipeline_mode = #tpu.pipeline_mode<synchronous>, transform_indices = @transform_0, window_bounds = array<i64: 16, 128>}, {transform_indices = @transform_1, window_bounds = array<i64: 128, 256>}, {transform_indices = @transform_2, window_bounds = array<i64: 16, 256>}]} {
    %c0 = arith.constant 0 : index
    %c0_0 = arith.constant 0 : index
    %0 = vector.load %arg1[%c0, %c0_0] : memref<16x128xbf16, #tpu.memory_space<vmem>>, vector<16x128xbf16>
    %c0_1 = arith.constant 0 : index
    %c0_2 = arith.constant 0 : index
    %1 = vector.load %arg2[%c0_1, %c0_2] : memref<128x256xbf16, #tpu.memory_space<vmem>>, vector<128x256xbf16>
    %cst = arith.constant dense<0.000000e+00> : vector<16x256xf32>
    %2 = tpu.matmul %0, %1, %cst {dimension_numbers = #tpu.dot_dimension_numbers<[1], [0], [0], [1], [0, 0, 1, 1], [], []>} : vector<16x128xbf16>, vector<128x256xbf16>, vector<16x256xf32> -> vector<16x256xf32>
    %cst_3 = arith.constant 0.000000e+00 : f32
    %3 = vector.broadcast %cst_3 : f32 to vector<16x256xf32>
    %4 = arith.cmpf oge, %2, %3 : vector<16x256xf32>
    %cst_4 = arith.constant 0.00999999977 : f32
    %5 = vector.broadcast %cst_4 : f32 to vector<16x256xf32>
    %6 = arith.mulf %5, %2 : vector<16x256xf32>
    %7 = arith.select %4, %2, %6 : vector<16x256xi1>, vector<16x256xf32>
    %c0_5 = arith.constant 0 : index
    %c0_6 = arith.constant 0 : index
    %8 = vector.load %arg3[%c0_5, %c0_6] : memref<16x256xf32, #tpu.memory_space<vmem>>, vector<16x256xf32>
    tpu.vector_store %arg3[%c0_5, %c0_6], %7 {strides = array<i32>} : memref<16x256xf32, #tpu.memory_space<vmem>>, vector<16x256xf32>,
    return
  }
  func.func @transform_0(%arg0: i32) -> (i32, i32) {
    %c0_i32 = arith.constant 0 : i32
    %c0_i32_0 = arith.constant 0 : i32
    %c0_i32_1 = arith.constant 0 : i32
    return %c0_i32, %c0_i32_0 : i32, i32
  }
  func.func @transform_1(%arg0: i32) -> (i32, i32) {
    %c0_i32 = arith.constant 0 : i32
    %c0_i32_0 = arith.constant 0 : i32
    return %c0_i32, %arg0 : i32, i32
  }
  func.func @transform_2(%arg0: i32) -> (i32, i32) {
    %c0_i32 = arith.constant 0 : i32
    %c0_i32_0 = arith.constant 0 : i32
    return %c0_i32, %arg0 : i32, i32
  }
}

</mosaic_0001>

<bundles_post_ra>
// kernel: conv2d_act_pallas.1
= control target key start
LH: loop header
LB: loop body
LE: loop exit
PB: predicated region body
PF: predicated region fallthrough
CT: control target
= control target key end

     0   :  { %s613_s9 = smov 0   ;;  %s615_s10 = smov 0   ;;  %s698_s0 = inlined_call_operand.vmem [shape: bf16[16,128], index: 0, kind: input, shape index: {}]   ;;  %s699_s1 = inlined_call_operand.vmem [shape: bf16[128,512], index: 1, kind: input, shape index: {}]   ;;  %s700_s2 = inlined_call_operand.vmem [shape: f32[16,512], index: 2, kind: output, shape index: {}]  }
   0x1   :  { %s617_s11 = smov 0  }
   0x2 LB: > { %s489_s12 = sadd.s32 4294967295, %s595_s11   ;;  %s630_s13 = sadd.s32 1, %s595_s11   ;;  %s595_s11 = sphi %s617_s11, %s704_s11   ;;  %s591_s10 = sphi %s615_s10, %s703_s10   ;;  %s587_s9 = sphi %s613_s9, %s702_s9  }
   0x3   : > { %s37_s14 = ssub.s32 %s595_s11, %s630_s13  ;;  %s40_s15 = sadd.s32 1, %s591_s10 }
   0x4   : > { %p38_p0 = scmp.eq.s32.totalorder %s37_s14, 0  ;;  %p47_p1 = scmp.ne.s32.totalorder %s591_s10, %s587_s9 }
   0x5   : > { %p48_p2 = scmp.eq.s32.totalorder %s595_s11, 0  ;;  %p77_p3 = scmp.eq.s32.totalorder %s489_s12, 1 }
   0x6   : > { %s641_s16 = scalar_select %p38_p0, %s591_s10, %s40_s15  }
   0x7   : > { %p49_p4 = por %p48_p2, %p47_p1  ;;  %p643_p5 = por %p77_p3, %p47_p1 }
   0x8   : > { %p492_p6 = scmp.ge.s32.totalorder %s595_s11, 2 }
   0xa   : > { %102 = sbr.rel (%p492_p6) target bundleno = 27 (0x1b), region = 20 }
   0xf   : > { %105 = sbr.rel (!%p49_p4) target bundleno = 27 (0x1b), region = 24  ;;  %s107_s18 = sand.u32 (%p49_p4), 1, %s591_s10  }
  0x10   : > { %s521_s19 = sshll.u32 (%p49_p4), %s595_s11, 3  ;;  %s493_s20 = sshll.u32 (%p49_p4), %s107_s18, 7 }
  0x11   : > { %s653_s23 = scalar_lea.vmem (%p49_p4), %s699_s1, %s521_s19  ;;  %s109_s24 = scalar_lea.vmem (%p49_p4), [#allocation2], %s493_s20 }
  0x12   : > { %v171_v0 = vld [vmem:[%s653_s23] sm:$0xff] (%p49_p4)  ;;  %v173_v1 = vld [vmem:[%s653_s23 + $0x10] sm:$0xff] (%p49_p4) }
  0x13   : > { %v175_v2 = vld [vmem:[%s653_s23 + $0x20] sm:$0xff] (%p49_p4)  ;;  %172 = vst [vmem:[%s109_s24] sm:$0xff] (%p49_p4), %v171_v0  ;;  %174 = vst [vmem:[%s109_s24 + $0x8] sm:$0xff] (%p49_p4), %v173_v1  ;;  %v177_v3 = vld [vmem:[%s653_s23 + $0x30] sm:$0xff] (%p49_p4) }
  0x14   : > { %176 = vst [vmem:[%s109_s24 + $0x10] sm:$0xff] %v175_v2  ;;  %v179_v4 = vld [vmem:[%s653_s23 + $0x40] sm:$0xff]  ;;  %v181_v5 = vld [vmem:[%s653_s23 + $0x50] sm:$0xff]  ;;  %178 = vst [vmem:[%s109_s24 + $0x18] sm:$0xff] %v177_v3 }
  0x15   : > { %180 = vst [vmem:[%s109_s24 + $0x20] sm:$0xff] %v179_v4  ;;  %182 = vst [vmem:[%s109_s24 + $0x28] sm:$0xff] %v181_v5  ;;  %v183_v6 = vld [vmem:[%s653_s23 + $0x60] sm:$0xff]  ;;  %v185_v7 = vld [vmem:[%s653_s23 + $0x70] sm:$0xff] }
  0x16   : > { %v187_v8 = vld [vmem:[%s653_s23 + $0x80] sm:$0xff]  ;;  %184 = vst [vmem:[%s109_s24 + $0x30] sm:$0xff] %v183_v6  ;;  %186 = vst [vmem:[%s109_s24 + $0x38] sm:$0xff] %v185_v7  ;;  %v189_v9 = vld [vmem:[%s653_s23 + $0x90] sm:$0xff] }
  0x17   : > { %188 = vst [vmem:[%s109_s24 + $0x40] sm:$0xff] %v187_v8  ;;  %v191_v10 = vld [vmem:[%s653_s23 + $0xa0] sm:$0xff]  ;;  %v193_v11 = vld [vmem:[%s653_s23 + $0xb0] sm:$0xff]  ;;  %190 = vst [vmem:[%s109_s24 + $0x48] sm:$0xff] %v189_v9 }
  0x18   : > { %192 = vst [vmem:[%s109_s24 + $0x50] sm:$0xff] %v191_v10  ;;  %194 = vst [vmem:[%s109_s24 + $0x58] sm:$0xff] %v193_v11  ;;  %v195_v12 = vld [vmem:[%s653_s23 + $0xc0] sm:$0xff]  ;;  %v197_v13 = vld [vmem:[%s653_s23 + $0xd0] sm:$0xff] }
  0x19   : > { %v199_v14 = vld [vmem:[%s653_s23 + $0xe0] sm:$0xff]  ;;  %196 = vst [vmem:[%s109_s24 + $0x60] sm:$0xff] %v195_v12  ;;  %198 = vst [vmem:[%s109_s24 + $0x68] sm:$0xff] %v197_v13  ;;  %v201_v15 = vld [vmem:[%s653_s23 + $0xf0] sm:$0xff] }
  0x1a   : > { %200 = vst [vmem:[%s109_s24 + $0x70] sm:$0xff] %v199_v14  ;;  %202 = vst [vmem:[%s109_s24 + $0x78] sm:$0xff] %v201_v15 }
  0x1b PF: > { %p496_p7 = scmp.ge.s32.totalorder %s595_s11, 1  ;;  %p207_p8 = scmp.lt.s32.totalorder %s595_s11, 3 }
  0x1d   : > { %p208_p9 = pnand %p496_p7, %p207_p8 }
  0x1e   : > { %s214_s25 = sand.u32 (!%p208_p9), 1, %s587_s9  }
  0x1f   : > { %211 = sbr.rel (%p208_p9) target bundleno = 280 (0x118), region = 62  ;;  %s497_s26 = sshll.u32 (!%p208_p9), %s214_s25, 7 }
  0x20   : > { %s216_s27 = scalar_lea.vmem (!%p208_p9), [#allocation2], %s497_s26  ;;  %s498_s30 = sshll.u32 (!%p208_p9), %s214_s25, 5 }
  0x21   : > { %s233_s3 = scalar_lea.vmem (!%p208_p9), [#allocation3], %s498_s30 }
  0x24   : > { %v597_v16 = vmov 0   ;;  %v548_v17 = vld [vmem:[%s216_s27 + $0x74] ss:$8 sps:$4 sm:$0xff]   ;;  %v550_v18 = vld [vmem:[%s216_s27 + $0x70] ss:$8 sps:$4 sm:$0xff]   ;;  %v572_v33 = vld [vmem:[%s698_s0] sm:$0xff]  }
  0x25   : > { %373 = vmatprep.mubr.bf16.mxu0 %v597_v16  ;;  %341 = vmatprep.subr.bf16.mxu0 %v548_v17  ;;  %v551_v19 = vld [vmem:[%s216_s27 + $0x64] ss:$8 sps:$4 sm:$0xff]   ;;  %v553_v20 = vld [vmem:[%s216_s27 + $0x60] ss:$8 sps:$4 sm:$0xff]   ;;  %v554_v21 = vld [vmem:[%s216_s27 + $0x54] ss:$8 sps:$4 sm:$0xff]  }
  0x26   : > { %342 = vmatpush1.bf16.msra.mxu0 %v550_v18  ;;  %v556_v22 = vld [vmem:[%s216_s27 + $0x50] ss:$8 sps:$4 sm:$0xff]   ;;  %v557_v23 = vld [vmem:[%s216_s27 + $0x44] ss:$8 sps:$4 sm:$0xff]   ;;  %v559_v24 = vld [vmem:[%s216_s27 + $0x40] ss:$8 sps:$4 sm:$0xff]  }
  0x27   : > { %343 = vmatprep.subr.bf16.mxu0 %v551_v19  ;;  %v560_v25 = vld [vmem:[%s216_s27 + $0x34] ss:$8 sps:$4 sm:$0xff]   ;;  %v562_v26 = vld [vmem:[%s216_s27 + $0x30] ss:$8 sps:$4 sm:$0xff]   ;;  %v563_v27 = vld [vmem:[%s216_s27 + $0x24] ss:$8 sps:$4 sm:$0xff]  }
  0x28   : > { %v565_v28 = vld [vmem:[%s216_s27 + $0x20] ss:$8 sps:$4 sm:$0xff]   ;;  %v566_v29 = vld [vmem:[%s216_s27 + $0x14] ss:$8 sps:$4 sm:$0xff]   ;;  %v568_v30 = vld [vmem:[%s216_s27 + $0x10] ss:$8 sps:$4 sm:$0xff]  }
  0x29   : > { %v569_v31 = vld [vmem:[%s216_s27 + $0x4] ss:$8 sps:$4 sm:$0xff]   ;;  %v571_v32 = vld [vmem:[%s216_s27] ss:$8 sps:$4 sm:$0xff]   ;;  %s522_s4 = sshll.u32 (%p643_p5), %s489_s12, 4 }
  0x2a   : > { %344 = vmatpush1.bf16.msra.mxu0 %v553_v20  ;;  %s409_s7 = scalar_lea.vmem (%p643_p5), %s700_s2, %s522_s4 }
  0x2b   : > { %345 = vmatprep.subr.bf16.mxu0 %v554_v21 }
  0x2e   : > { %346 = vmatpush1.bf16.msra.mxu0 %v556_v22 }
  0x2f   : > { %347 = vmatprep.subr.bf16.mxu0 %v557_v23 }
  0x32   : > { %348 = vmatpush1.bf16.msra.mxu0 %v559_v24 }
  0x33   : > { %349 = vmatprep.subr.bf16.mxu0 %v560_v25 }
  0x36   : > { %350 = vmatpush1.bf16.msra.mxu0 %v562_v26 }
  0x37   : > { %351 = vmatprep.subr.bf16.mxu0 %v563_v27 }
  0x3a   : > { %352 = vmatpush1.bf16.msra.mxu0 %v565_v28 }
  0x3b   : > { %353 = vmatprep.subr.bf16.mxu0 %v566_v29 }
  0x3e   : > { %354 = vmatpush1.bf16.msra.mxu0 %v568_v30 }
  0x3f   : > { %355 = vmatprep.subr.bf16.mxu0 %v569_v31 }
  0x42   : > { %356 = vmatpush1.bf16.msra.mxu0 %v571_v32 }
  0x45   : > { %374 = vmatmul.mubr.bf16.vlgmr.msra.gmra.mxu0 %v572_v33 }
 0x105   : > { %v375_v34 = vpop.f32.mrf.mxu0 }
 0x106   : > { %vm384_vm0 = vcmp.ge.f32.partialorder %v375_v34, 0.0  ;;  %v388_v35 = vmul.f32 0.01, %v375_v34 }
 0x107   : > { %v377_v36 = vpop.f32.mrf.mxu0 }
 0x108   : > { %v392_v37 = vsel %vm384_vm0, %v375_v34, %v388_v35  ;;  %vm385_vm1 = vcmp.ge.f32.partialorder %v377_v36, 0.0  ;;  %v389_v38 = vmul.f32 0.01, %v377_v36 }
 0x109   : > { %396 = vst [vmem:[%s233_s3] sm:$0xff] %v392_v37  ;;  %v379_v39 = vpop.f32.mrf.mxu0 }
 0x10a   : > { %v393_v40 = vsel %vm385_vm1, %v377_v36, %v389_v38  ;;  %vm386_vm2 = vcmp.ge.f32.partialorder %v379_v39, 0.0  ;;  %v390_v41 = vmul.f32 0.01, %v379_v39 }
 0x10b   : > { %397 = vst [vmem:[%s233_s3 + $0x8] sm:$0xff] %v393_v40  ;;  %v381_v42 = vpop.f32.mrf.mxu0  ;;  %406 = sbr.rel (!%p643_p5) target bundleno = 280 (0x118), region = 70 }
 0x10c   : > { %v394_v43 = vsel %vm386_vm2, %v379_v39, %v390_v41  ;;  %vm387_vm3 = vcmp.ge.f32.partialorder %v381_v42, 0.0  ;;  %v391_v44 = vmul.f32 0.01, %v381_v42 }
 0x10d   : > { %398 = vst [vmem:[%s233_s3 + $0x10] sm:$0xff] %v394_v43 }
 0x10e   : > { %v395_v45 = vsel %vm387_vm3, %v381_v42, %v391_v44 }
 0x10f   : > { %399 = vst [vmem:[%s233_s3 + $0x18] sm:$0xff] %v395_v45 }
 0x110   : > { %v422_v46 = vld [vmem:[%s233_s3] sm:$0xff] }
 0x111   : > { %423 = vst [vmem:[%s409_s7] sm:$0xff] %v422_v46 }
 0x112   : > { %v424_v47 = vld [vmem:[%s233_s3 + $0x8] sm:$0xff] }
 0x113   : > { %425 = vst [vmem:[%s409_s7 + $0x8] sm:$0xff] %v424_v47 }
 0x114   : > { %v426_v48 = vld [vmem:[%s233_s3 + $0x10] sm:$0xff] }
 0x115   : > { %427 = vst [vmem:[%s409_s7 + $0x20] sm:$0xff] %v426_v48 }
 0x116   : > { %v428_v49 = vld [vmem:[%s233_s3 + $0x18] sm:$0xff] }
 0x117   : > { %429 = vst [vmem:[%s409_s7 + $0x28] sm:$0xff] %v428_v49 }
 0x118 PF: > { %p9_p10 = scmp.ge.s32.totalorder %s630_s13, 4   ;;  %s702_s9 = smov %s591_s10 }
 0x119   : > { %s703_s10 = smov %s641_s16  ;;  %s704_s11 = smov %s630_s13 }
 0x11a   :  { %11 = sbr.rel (!%p9_p10) target bundleno = 2 (0x2), region = 124 }

</bundles_post_ra>
